<compile_context>
chip_gen: v5e
topology: v5e:2x2
jax: 0.10.0
libtpu: 0.0.40
codegen_flags: <defaults>
</compile_context>

<pallas_src>
import functools

import jax
import jax.numpy as jnp
from jax.experimental import pallas as pl
from jax.experimental.pallas import tpu as pltpu

_LANES = 128
_SUBLANES = 8
_PAD_CHUNK = _SUBLANES * _LANES      # 1024 elements -> rows always a multiple of 8
_MAX_BLOCK_ROWS = 1024               # (1024, 128) f32 block = 512 KiB per input


def _round_up(x, m):
    return ((x + m - 1) // m) * m


def _fused_l1_kernel(a1_ref, b1_ref, a2_ref, b2_ref, o1_ref, o2_ref, *,
                     rows1, rows2, steps_inner, mask1, mask2):
    """Accumulate |a-b| for two tensor pairs into resident VMEM output blocks."""
    j = pl.program_id(1)                       # reduction ("arbitrary") axis
    step = pl.program_id(0) * steps_inner + j  # global streaming step

    @pl.when(j == 0)
    def _init():
        o1_ref[...] = jnp.zeros_like(o1_ref)
        o2_ref[...] = jnp.zeros_like(o2_ref)

    def _accum(a_ref, b_ref, o_ref, rows_total, needs_mask):
        d = jnp.abs(a_ref[...].astype(jnp.float32) - b_ref[...].astype(jnp.float32))
        if needs_mask:  # static (trace-time): only emitted when actually required
            br = a_ref.shape[0]
            # Global row id of every element; rows past the end of this tensor
            # (partial last block, or steps beyond its stream) contribute 0.
            row_ids = step * br + jax.lax.broadcasted_iota(jnp.int32, d.shape, 0)
            d = jnp.where(row_ids < rows_total, d, 0.0)
        o_ref[...] += d

    _accum(a1_ref, b1_ref, o1_ref, rows1, mask1)
    _accum(a2_ref, b2_ref, o2_ref, rows2, mask2)


def _clamped_index_map(num_blocks, steps_inner):
    """Block index = min(global_step, last_block): keeps DMAs in bounds for a
    shorter stream; a repeated (clamped) index is not re-DMA'd by the pipeline."""
    last = num_blocks - 1

    def index_map(i, j):
        return (jnp.minimum(i * steps_inner + j, last), 0)

    return index_map


def _to_lane_major(x):
    """Flatten to a lane-dense (rows, 128) slab; rows is a multiple of 8.

    Padding is a static decision and only materializes a copy when
    numel % 1024 != 0 (it is applied to both operands of a pair, so the padded
    region contributes exactly 0 to the L1 sum)."""
    flat = x.reshape(-1)
    n = flat.shape[0]
    rem = n % _PAD_CHUNK
    if rem:  # static (trace-time) check
        flat = jnp.pad(flat, (0, _PAD_CHUNK - rem))
    return flat.reshape(-1, _LANES), n


def fused_l1_means(a1, b1, a2, b2):
    """Returns (mean|a1-b1|, mean|a2-b2|) from one fused Pallas reduction."""
    assert a1.shape == b1.shape, (a1.shape, b1.shape)
    assert a2.shape == b2.shape, (a2.shape, b2.shape)

    a1_2d, n1 = _to_lane_major(a1)
    b1_2d, _ = _to_lane_major(b1)
    a2_2d, n2 = _to_lane_major(a2)
    b2_2d, _ = _to_lane_major(b2)

    rows1, rows2 = a1_2d.shape[0], a2_2d.shape[0]

    # Shared grid length, driven by the larger stream at max block size.
    t = max(pl.cdiv(rows1, _MAX_BLOCK_ROWS), pl.cdiv(rows2, _MAX_BLOCK_ROWS))
    # Balance per-pair block rows so both streams finish on the same grid
    # (rows are multiples of 8, so br <= rows always holds).
    br1 = min(_MAX_BLOCK_ROWS, _round_up(pl.cdiv(rows1, t), _SUBLANES))
    br2 = min(_MAX_BLOCK_ROWS, _round_up(pl.cdiv(rows2, t), _SUBLANES))
    t1 = pl.cdiv(rows1, br1)
    t2 = pl.cdiv(rows2, br2)

    # Split the reduction across 2 cores (megacore / v7x) when there is enough
    # work; each half accumulates into its own output block.
    n_split = 2 if t >= 2 else 1
    steps_inner = pl.cdiv(t, n_split)
    total_steps = n_split * steps_inner

    # Static mask decisions: masking only needed if the last block is partial
    # or some grid steps run past the end of that stream.
    mask1 = (rows1 % br1 != 0) or (t1 != total_steps)
    mask2 = (rows2 % br2 != 0) or (t2 != total_steps)

    kernel = functools.partial(
        _fused_l1_kernel, rows1=rows1, rows2=rows2, steps_inner=steps_inner,
        mask1=mask1, mask2=mask2)

    o1, o2 = pl.pallas_call(
        kernel,
        out_shape=(
            jax.ShapeDtypeStruct((n_split * br1, _LANES), jnp.float32),
            jax.ShapeDtypeStruct((n_split * br2, _LANES), jnp.float32),
        ),
        grid_spec=pltpu.PrefetchScalarGridSpec(
            num_scalar_prefetch=0,
            grid=(n_split, steps_inner),
            in_specs=[
                pl.BlockSpec((br1, _LANES), _clamped_index_map(t1, steps_inner)),
                pl.BlockSpec((br1, _LANES), _clamped_index_map(t1, steps_inner)),
                pl.BlockSpec((br2, _LANES), _clamped_index_map(t2, steps_inner)),
                pl.BlockSpec((br2, _LANES), _clamped_index_map(t2, steps_inner)),
            ],
            out_specs=(
                # Output block index depends only on the parallel axis -> stays
                # resident in VMEM across the whole reduction (accumulator).
                pl.BlockSpec((br1, _LANES), lambda i, j: (i, 0)),
                pl.BlockSpec((br2, _LANES), lambda i, j: (i, 0)),
            ),
        ),
        compiler_params=pltpu.CompilerParams(
            dimension_semantics=("parallel", "arbitrary"),
        ),
    )(a1_2d, b1_2d, a2_2d, b2_2d)

    # Tiny final cross-lane reduction (and per-core partial merge) in XLA.
    mean1 = jnp.sum(o1) / jnp.float32(n1)
    mean2 = jnp.sum(o2) / jnp.float32(n2)
    return mean1, mean2


def teacher_lr_constraint_loss(pred_dict, LR, HR, lambda1=1.0, lambda2=1.0):
    """JAX/Pallas equivalent of TeacherLRConstraintLoss.forward (reduction='mean')."""
    imitation_loss, gt_loss = fused_l1_means(pred_dict["encoder"], LR,
                                             pred_dict["hr"], HR)
    loss_dict = {
        "loss": lambda1 * gt_loss + lambda2 * imitation_loss,
        "gt_loss": lambda1 * gt_loss,
        "imitation_loss": lambda2 * imitation_loss,
    }
    return loss_dict


if __name__ == "__main__":
    key = jax.random.PRNGKey(0)
    k1, k2, k3, k4 = jax.random.split(key, 4)

    # Small NCHW shapes: LR-space (2,4,16,16), HR-space (2,4,32,32).
    LR = jax.random.normal(k1, (2, 4, 16, 16), dtype=jnp.float32)
    encoded_lr = jax.random.normal(k2, (2, 4, 16, 16), dtype=jnp.float32)
    HR = jax.random.normal(k3, (2, 4, 32, 32), dtype=jnp.float32)
    pred_hr = jax.random.normal(k4, (2, 4, 32, 32), dtype=jnp.float32)

    pred_dict = {"hr": pred_hr, "encoder": encoded_lr}

    loss_dict = teacher_lr_constraint_loss(pred_dict, LR, HR, lambda1=1.0, lambda2=1.0)
    jax.block_until_ready(loss_dict)

    # Reference check against plain jnp.
    ref_imit = jnp.mean(jnp.abs(encoded_lr - LR))
    ref_gt = jnp.mean(jnp.abs(pred_hr - HR))
    ref_loss = ref_gt + ref_imit
    assert jnp.allclose(loss_dict["imitation_loss"], ref_imit, rtol=1e-5, atol=1e-6)
    assert jnp.allclose(loss_dict["gt_loss"], ref_gt, rtol=1e-5, atol=1e-6)
    assert jnp.allclose(loss_dict["loss"], ref_loss, rtol=1e-5, atol=1e-6)

    print("KERNEL_OK")
</pallas_src>

<mosaic_0001>
module attributes {stable_mosaic.version = 11 : i64} {
  func.func @_fused_l1_kernel(%arg0: i32, %arg1: i32, %arg2: memref<16x128xf32, #tpu.memory_space<vmem>>, %arg3: memref<16x128xf32, #tpu.memory_space<vmem>>, %arg4: memref<64x128xf32, #tpu.memory_space<vmem>>, %arg5: memref<64x128xf32, #tpu.memory_space<vmem>>, %arg6: memref<16x128xf32, #tpu.memory_space<vmem>>, %arg7: memref<64x128xf32, #tpu.memory_space<vmem>>) attributes {dimension_semantics = [#tpu.dimension_semantics<parallel>, #tpu.dimension_semantics<arbitrary>], iteration_bounds = array<i64: 1, 1>, scalar_prefetch = 0 : i64, scratch_operands = 0 : i64, tpu.core_type = #tpu.core_type<tc>, window_params = [{transform_indices = @transform_0, window_bounds = array<i64: 16, 128>}, {transform_indices = @transform_1, window_bounds = array<i64: 16, 128>}, {transform_indices = @transform_2, window_bounds = array<i64: 64, 128>}, {transform_indices = @transform_3, window_bounds = array<i64: 64, 128>}, {transform_indices = @transform_4, window_bounds = array<i64: 16, 128>}, {transform_indices = @transform_5, window_bounds = array<i64: 64, 128>}]} {
    %c0_i32 = arith.constant 0 : i32
    %0 = arith.cmpi eq, %arg1, %c0_i32 : i32
    %1 = arith.extui %0 : i1 to i32
    %c0_i32_0 = arith.constant 0 : i32
    %2 = arith.cmpi ne, %1, %c0_i32_0 : i32
    scf.if %2 {
      %cst = arith.constant 0.000000e+00 : f32
      %17 = vector.broadcast %cst : f32 to vector<16x128xf32>
      %c0_16 = arith.constant 0 : index
      %c0_17 = arith.constant 0 : index
      %18 = vector.load %arg6[%c0_16, %c0_17] : memref<16x128xf32, #tpu.memory_space<vmem>>, vector<16x128xf32>
      tpu.vector_store %arg6[%c0_16, %c0_17], %17 {strides = array<i32>} : memref<16x128xf32, #tpu.memory_space<vmem>>, vector<16x128xf32>,
      %cst_18 = arith.constant 0.000000e+00 : f32
      %19 = vector.broadcast %cst_18 : f32 to vector<64x128xf32>
      %c0_19 = arith.constant 0 : index
      %c0_20 = arith.constant 0 : index
      %20 = vector.load %arg7[%c0_19, %c0_20] : memref<64x128xf32, #tpu.memory_space<vmem>>, vector<64x128xf32>
      tpu.vector_store %arg7[%c0_19, %c0_20], %19 {strides = array<i32>} : memref<64x128xf32, #tpu.memory_space<vmem>>, vector<64x128xf32>,
    } else {
    }
    %c0 = arith.constant 0 : index
    %c0_1 = arith.constant 0 : index
    %3 = vector.load %arg2[%c0, %c0_1] : memref<16x128xf32, #tpu.memory_space<vmem>>, vector<16x128xf32>
    %c0_2 = arith.constant 0 : index
    %c0_3 = arith.constant 0 : index
    %4 = vector.load %arg3[%c0_2, %c0_3] : memref<16x128xf32, #tpu.memory_space<vmem>>, vector<16x128xf32>
    %5 = arith.subf %3, %4 : vector<16x128xf32>
    %6 = math.absf %5 : vector<16x128xf32>
    %c0_4 = arith.constant 0 : index
    %c0_5 = arith.constant 0 : index
    %7 = vector.load %arg6[%c0_4, %c0_5] : memref<16x128xf32, #tpu.memory_space<vmem>>, vector<16x128xf32>
    %8 = arith.addf %7, %6 : vector<16x128xf32>
    %c0_6 = arith.constant 0 : index
    %c0_7 = arith.constant 0 : index
    %9 = vector.load %arg6[%c0_6, %c0_7] : memref<16x128xf32, #tpu.memory_space<vmem>>, vector<16x128xf32>
    tpu.vector_store %arg6[%c0_6, %c0_7], %8 {strides = array<i32>} : memref<16x128xf32, #tpu.memory_space<vmem>>, vector<16x128xf32>,
    %c0_8 = arith.constant 0 : index
    %c0_9 = arith.constant 0 : index
    %10 = vector.load %arg4[%c0_8, %c0_9] : memref<64x128xf32, #tpu.memory_space<vmem>>, vector<64x128xf32>
    %c0_10 = arith.constant 0 : index
    %c0_11 = arith.constant 0 : index
    %11 = vector.load %arg5[%c0_10, %c0_11] : memref<64x128xf32, #tpu.memory_space<vmem>>, vector<64x128xf32>
    %12 = arith.subf %10, %11 : vector<64x128xf32>
    %13 = math.absf %12 : vector<64x128xf32>
    %c0_12 = arith.constant 0 : index
    %c0_13 = arith.constant 0 : index
    %14 = vector.load %arg7[%c0_12, %c0_13] : memref<64x128xf32, #tpu.memory_space<vmem>>, vector<64x128xf32>
    %15 = arith.addf %14, %13 : vector<64x128xf32>
    %c0_14 = arith.constant 0 : index
    %c0_15 = arith.constant 0 : index
    %16 = vector.load %arg7[%c0_14, %c0_15] : memref<64x128xf32, #tpu.memory_space<vmem>>, vector<64x128xf32>
    tpu.vector_store %arg7[%c0_14, %c0_15], %15 {strides = array<i32>} : memref<64x128xf32, #tpu.memory_space<vmem>>, vector<64x128xf32>,
    return
  }
  func.func @transform_0(%arg0: i32, %arg1: i32) -> (i32, i32) {
    %c1_i32 = arith.constant 1 : i32
    %0 = arith.muli %arg0, %c1_i32 : i32
    %1 = arith.addi %0, %arg1 : i32
    %c0_i32 = arith.constant 0 : i32
    %2 = arith.minsi %1, %c0_i32 : i32
    %c0_i32_0 = arith.constant 0 : i32
    %c0_i32_1 = arith.constant 0 : i32
    return %2, %c0_i32_0 : i32, i32
  }
  func.func @transform_1(%arg0: i32, %arg1: i32) -> (i32, i32) {
    %c1_i32 = arith.constant 1 : i32
    %0 = arith.muli %arg0, %c1_i32 : i32
    %1 = arith.addi %0, %arg1 : i32
    %c0_i32 = arith.constant 0 : i32
    %2 = arith.minsi %1, %c0_i32 : i32
    %c0_i32_0 = arith.constant 0 : i32
    %c0_i32_1 = arith.constant 0 : i32
    return %2, %c0_i32_0 : i32, i32
  }
  func.func @transform_2(%arg0: i32, %arg1: i32) -> (i32, i32) {
    %c1_i32 = arith.constant 1 : i32
    %0 = arith.muli %arg0, %c1_i32 : i32
    %1 = arith.addi %0, %arg1 : i32
    %c0_i32 = arith.constant 0 : i32
    %2 = arith.minsi %1, %c0_i32 : i32
    %c0_i32_0 = arith.constant 0 : i32
    %c0_i32_1 = arith.constant 0 : i32
    return %2, %c0_i32_0 : i32, i32
  }
  func.func @transform_3(%arg0: i32, %arg1: i32) -> (i32, i32) {
    %c1_i32 = arith.constant 1 : i32
    %0 = arith.muli %arg0, %c1_i32 : i32
    %1 = arith.addi %0, %arg1 : i32
    %c0_i32 = arith.constant 0 : i32
    %2 = arith.minsi %1, %c0_i32 : i32
    %c0_i32_0 = arith.constant 0 : i32
    %c0_i32_1 = arith.constant 0 : i32
    return %2, %c0_i32_0 : i32, i32
  }
  func.func @transform_4(%arg0: i32, %arg1: i32) -> (i32, i32) {
    %c0_i32 = arith.constant 0 : i32
    %c0_i32_0 = arith.constant 0 : i32
    return %arg0, %c0_i32 : i32, i32
  }
  func.func @transform_5(%arg0: i32, %arg1: i32) -> (i32, i32) {
    %c0_i32 = arith.constant 0 : i32
    %c0_i32_0 = arith.constant 0 : i32
    return %arg0, %c0_i32 : i32, i32
  }
}

</mosaic_0001>

<bundles_post_ra>
// kernel: tpu_custom_call.1
= control target key start
LH: loop header
LB: loop body
LE: loop exit
PB: predicated region body
PF: predicated region fallthrough
CT: control target
= control target key end

     0   :  { %11 = vsyncpa [#allocation3], 0  ;;  %s495_s0 = inlined_call_operand.hbm [shape: f32[16,128], index: 0, kind: input, shape index: {}]   ;;  %s496_s1 = inlined_call_operand.hbm [shape: f32[16,128], index: 1, kind: input, shape index: {}]   ;;  %s497_s2 = inlined_call_operand.hbm [shape: f32[64,128], index: 2, kind: input, shape index: {}]   ;;  %s498_s3 = inlined_call_operand.hbm [shape: f32[64,128], index: 3, kind: input, shape index: {}]   ;;  %s499_s4 = inlined_call_operand.hbm [shape: f32[16,128], index: 4, kind: output, shape index: {0}]   ;;  %s500_s5 = inlined_call_operand.hbm [shape: f32[64,128], index: 5, kind: output, shape index: {1}]  }
   0x1   :  { %12 = vsyncpa [#allocation6], 0 }
   0x2   :  { %13 = vsyncpa [#allocation9], 0 }
   0x3   :  { %14 = vsyncpa [#allocation4], 0 }
   0x4   :  { %15 = vsyncpa [#allocation12], 0  ;;  %s45_s20 = sshll.u32 %s496_s1, 4  ;;  %s418_s21 = smov [#allocation5]   ;;  %s46_s20 = int_to_ptr.hbm [resolvable:$true] %s45_s20 }
   0x5   :  { %s47_s22 = sshll.u32 %s418_s21, 4  ;;  %s26_s25 = sshll.u32 %s495_s0, 4  ;;  %s48_s22 = int_to_ptr.vmem [resolvable:$true] %s47_s22  ;;  %s27_s25 = int_to_ptr.hbm [resolvable:$true] %s26_s25 }
   0x6   :  { %s419_s26 = smov 128   ;;  %s420_s27 = smov 8  }
   0x7   :  { %53 = dma.hbm_to_vmem [thread:$0]  %s46_s20, 256, %s48_s22, [#allocation6], %s419_s26, %s419_s26, %s420_s27  }
   0x8   :  { %s421_s28 = smov [#allocation2]   ;;  %s64_s1 = sshll.u32 %s497_s2, 4  ;;  %s65_s1 = int_to_ptr.hbm [resolvable:$true] %s64_s1 }
   0x9   :  { %s28_s29 = sshll.u32 %s421_s28, 4  ;;  %s83_s8 = sshll.u32 %s498_s3, 4  ;;  %s29_s29 = int_to_ptr.vmem [resolvable:$true] %s28_s29  ;;  %s84_s8 = int_to_ptr.hbm [resolvable:$true] %s83_s8 }
   0xa   :  { %34 = dma.hbm_to_vmem [thread:$0]  %s27_s25, 256, %s29_s29, [#allocation3], %s419_s26, %s419_s26, %s420_s27  }
   0xb   :  { %s422_s9 = smov [#allocation7]   ;;  %s423_s11 = smov [#allocation8]  }
   0xc   :  { %s66_s10 = sshll.u32 %s422_s9, 4  ;;  %s85_s2 = sshll.u32 %s423_s11, 4  ;;  %s67_s10 = int_to_ptr.vmem [resolvable:$true] %s66_s10  ;;  %s86_s2 = int_to_ptr.vmem [resolvable:$true] %s85_s2 }
   0xd   :  { %72 = dma.hbm_to_vmem [thread:$0]  %s65_s1, 1024, %s67_s10, [#allocation6], %s419_s26, %s419_s26, %s420_s27  }
   0xe   :  { %91 = dma.hbm_to_vmem [thread:$0]  %s84_s8, 1024, %s86_s2, [#allocation9], %s419_s26, %s419_s26, %s420_s27  }
   0xf   :  { %408 = dma.done.wait [#allocation3], 256  }
  0x10   :  { %409 = vsyncadd [#allocation3], 4294967040 }
  0x11   :  { %410 = dma.done.wait [#allocation6], 1280  }
  0x12   :  { %411 = vsyncadd [#allocation6], 4294966016 }
  0x13   :  { %412 = dma.done.wait [#allocation9], 1024  }
  0x14   :  { %413 = vsyncadd [#allocation9], 4294966272  ;;  %v138_v0 = vld [vmem:[#allocation2] sm:$0xff]  ;;  %v140_v1 = vld [vmem:[#allocation5] sm:$0xff]  ;;  %s214_s13 = sshll.u32 %s499_s4, 4  ;;  %s424_s14 = smov [#allocation10]   ;;  %s215_s13 = int_to_ptr.hbm [resolvable:$true] %s214_s13 }
  0x15   :  { %v139_v2 = vld [vmem:[#allocation2 + $0x8] sm:$0xff]  ;;  %v142_v3 = vsub.f32 %v138_v0, %v140_v1  ;;  %v141_v4 = vld [vmem:[#allocation5 + $0x8] sm:$0xff]  ;;  %v152_v5 = vld [vmem:[#allocation7] sm:$0xff]  ;;  %s483_s15 = sshll.u32 %s424_s14, 4  ;;  %s425_s4 = smov [#allocation11]   ;;  %s213_s15 = int_to_ptr.vmem [resolvable:$true] %s483_s15 }
  0x16   :  { %v160_v6 = vld [vmem:[#allocation8] sm:$0xff]  ;;  %v143_v7 = vsub.f32 %v139_v2, %v141_v4  ;;  %v153_v9 = vld [vmem:[#allocation7 + $0x8] sm:$0xff]  ;;  %v154_v11 = vld [vmem:[#allocation7 + $0x10] sm:$0xff]  ;;  %s225_s16 = sshll.u32 %s425_s4, 4  ;;  %s227_s19 = sshll.u32 %s500_s5, 4  ;;  %s226_s16 = int_to_ptr.vmem [resolvable:$true] %s225_s16  ;;  %s228_s19 = int_to_ptr.hbm [resolvable:$true] %s227_s19 }
  0x17   :  { %v168_v8 = vsub.f32 %v152_v5, %v160_v6  ;;  %v161_v10 = vld [vmem:[#allocation8 + $0x8] sm:$0xff]  ;;  %v144_v12 = vand.u32 2147483647, %v142_v3  ;;  %v162_v14 = vld [vmem:[#allocation8 + $0x10] sm:$0xff]  ;;  %v155_v15 = vld [vmem:[#allocation7 + $0x18] sm:$0xff] }
  0x18   :  { %v169_v13 = vsub.f32 %v153_v9, %v161_v10  ;;  %v163_v16 = vld [vmem:[#allocation8 + $0x18] sm:$0xff]  ;;  %v145_v17 = vand.u32 2147483647, %v143_v7  ;;  %v170_v19 = vsub.f32 %v154_v11, %v162_v14  ;;  %v156_v21 = vld [vmem:[#allocation7 + $0x20] sm:$0xff]  ;;  %v157_v25 = vld [vmem:[#allocation7 + $0x28] sm:$0xff] }
  0x19   :  { %v176_v18 = vand.u32 2147483647, %v168_v8  ;;  %v171_v20 = vsub.f32 %v155_v15, %v163_v16  ;;  %v164_v22 = vld [vmem:[#allocation8 + $0x20] sm:$0xff]  ;;  %v165_v26 = vld [vmem:[#allocation8 + $0x28] sm:$0xff]  ;;  %v158_v27 = vld [vmem:[#allocation7 + $0x30] sm:$0xff]  ;;  %150 = vst [vmem:[#allocation10] sm:$0xff] %v144_v12 }
  0x1a   :  { %v177_v23 = vand.u32 2147483647, %v169_v13  ;;  %v172_v24 = vsub.f32 %v156_v21, %v164_v22  ;;  %v178_v28 = vand.u32 2147483647, %v170_v19  ;;  %v166_v30 = vld [vmem:[#allocation8 + $0x30] sm:$0xff]  ;;  %v159_v31 = vld [vmem:[#allocation7 + $0x38] sm:$0xff]  ;;  %v173_v33 = vsub.f32 %v157_v25, %v165_v26 }
  0x1b   :  { %v179_v29 = vand.u32 2147483647, %v171_v20  ;;  %v174_v34 = vsub.f32 %v158_v27, %v166_v30  ;;  %v167_v35 = vld [vmem:[#allocation8 + $0x38] sm:$0xff]  ;;  %151 = vst [vmem:[#allocation10 + $0x8] sm:$0xff] %v145_v17 }
  0x1c   :  { %v180_v32 = vand.u32 2147483647, %v172_v24  ;;  %v175_v36 = vsub.f32 %v159_v31, %v167_v35  ;;  %200 = vst [vmem:[#allocation11] sm:$0xff] %v176_v18  ;;  %v181_v37 = vand.u32 2147483647, %v173_v33 }
  0x1d   :  { %v182_v38 = vand.u32 2147483647, %v174_v34  ;;  %201 = vst [vmem:[#allocation11 + $0x8] sm:$0xff] %v177_v23  ;;  %220 = dma.vmem_to_hbm [thread:$0]  %s213_s15, 256, %s215_s13, [#allocation4], %s419_s26, %s419_s26, %s420_s27  }
  0x1e   :  { %v183_v39 = vand.u32 2147483647, %v175_v36  ;;  %202 = vst [vmem:[#allocation11 + $0x10] sm:$0xff] %v178_v28 }
  0x1f   :  { %203 = vst [vmem:[#allocation11 + $0x18] sm:$0xff] %v179_v29 }
  0x20   :  { %204 = vst [vmem:[#allocation11 + $0x20] sm:$0xff] %v180_v32 }
  0x21   :  { %205 = vst [vmem:[#allocation11 + $0x28] sm:$0xff] %v181_v37 }
  0x22   :  { %206 = vst [vmem:[#allocation11 + $0x30] sm:$0xff] %v182_v38 }
  0x23   :  { %207 = vst [vmem:[#allocation11 + $0x38] sm:$0xff] %v183_v39 }
  0x24   :  { %233 = dma.vmem_to_hbm [thread:$0]  %s226_s16, 1024, %s228_s19, [#allocation12], %s419_s26, %s419_s26, %s420_s27  }
  0x25   :  { %414 = dma.done.wait [#allocation4], 256  }
  0x26   :  { %415 = vsyncadd [#allocation4], 4294967040 }
  0x27   :  { %416 = dma.done.wait [#allocation12], 1024  }
  0x28   :  { %417 = vsyncadd [#allocation12], 4294966272 }
  0x29   :  { %242 = vsyncpa [#allocation3], 1 }
  0x2a   :  { %243 = vsyncpa [#allocation6], 1 }
  0x2b   :  { %244 = vsyncpa [#allocation9], 1 }
  0x2c   :  { %245 = vsyncpa [#allocation4], 1 }
  0x2d   :  { %246 = vsyncpa [#allocation12], 1 }

</bundles_post_ra>
